<compile_context>
chip_gen: v6e
topology: v6e:2x2x1
jax: 0.10.0
libtpu: 0.0.40
codegen_flags: <defaults>
</compile_context>

<pallas_src>
import jax
import jax.numpy as jnp
from jax.experimental import pallas as pl
from jax.experimental.pallas import tpu as pltpu

_LANES = 128                      # lane-dense minor dim -> full-width vld/vst
_MAX_TILE_ROWS = 16384            # 16384 x 128 x f32 = 8 MiB per block
_VMEM_LIMIT = 48 * 1024 * 1024    # 2 in + 2 out 8 MiB buffers = 32 MiB + headroom


def logreg_kernel(wh_ref, bh_ref, x_ref, o_ref):
    # wh_ref, bh_ref: (1, 1) f32 in SMEM holding 0.5*w and 0.5*b.
    # x_ref, o_ref:   (tile_r, 128) f32 tiles in VMEM.
    wh = wh_ref[0, 0]
    bh = bh_ref[0, 0]
    t = jnp.tanh(x_ref[...] * wh + bh)   # VPU mul/add + single EUP op
    o_ref[...] = 0.5 * t + 0.5           # == sigmoid(x * w + b)


def _round_up(v, m):
    return ((v + m - 1) // m) * m


def _run_slab(wh, bh, slab, tile_r):
    rows, lanes = slab.shape
    grid = (pl.cdiv(rows, tile_r),)
    return pl.pallas_call(
        logreg_kernel,
        out_shape=jax.ShapeDtypeStruct((rows, lanes), jnp.float32),
        grid_spec=pltpu.PrefetchScalarGridSpec(
            num_scalar_prefetch=0,
            grid=grid,
            in_specs=[
                pl.BlockSpec(memory_space=pltpu.MemorySpace.SMEM),  # 0.5*w
                pl.BlockSpec(memory_space=pltpu.MemorySpace.SMEM),  # 0.5*b
                pl.BlockSpec((tile_r, lanes), lambda i: (i, 0)),    # x tile
            ],
            out_specs=pl.BlockSpec((tile_r, lanes), lambda i: (i, 0)),
        ),
        compiler_params=pltpu.CompilerParams(
            dimension_semantics=("parallel",),   # batch axis: megacore-shardable
            vmem_limit_bytes=_VMEM_LIMIT,
        ),
    )(wh, bh, slab)


@jax.jit
def logistic_regression(x, weight, bias):
    """x: (N, 1) f32; weight: (1, 1) f32 (PyTorch [out, in]); bias: (1,) f32."""
    n = x.shape[0]
    w = weight.reshape(()).astype(jnp.float32)
    b = bias.reshape(()).astype(jnp.float32)
    # Fold the 0.5 tanh pre-scale into the SMEM scalars (free on the scalar side).
    wh = (0.5 * w).reshape(1, 1)
    bh = (0.5 * b).reshape(1, 1)

    flat = x.reshape(-1).astype(jnp.float32)     # in_features == 1 -> free reshape

    if n < 8 * _LANES:
        # Tiny batch: pad to one minimal (8, 128) tile (<= 4 KiB, negligible).
        padded = jnp.pad(flat, (0, 8 * _LANES - n))
        out = _run_slab(wh, bh, padded.reshape(8, _LANES), 8)
        return out.reshape(-1)[:n].reshape(n, 1)

    rows = n // _LANES            # >= 8
    tail_n = n - rows * _LANES    # < 128

    # Large blocks (up to 8 MiB) to amortize the ~0.35 us per-grid-step overhead,
    # but no larger than ~rows/2 so the parallel axis keeps >= 2 steps (v7x 2 TCs);
    # always a multiple of 8 (sublane tiling).  Never exceeds `rows`.
    tile_r = min(_MAX_TILE_ROWS, _round_up(pl.cdiv(rows, 2), 8))

    main = flat[: rows * _LANES].reshape(rows, _LANES)   # free when tail_n == 0
    main_out = _run_slab(wh, bh, main, tile_r).reshape(-1)

    if tail_n == 0:
        return main_out.reshape(n, 1)

    # <128-element ragged tail: plain sigmoid (fused by XLA).  Avoids padding the
    # whole array and re-streaming it through HBM.
    tail_out = jax.nn.sigmoid(flat[rows * _LANES:] * w + b)
    return jnp.concatenate([main_out, tail_out]).reshape(n, 1)


if __name__ == "__main__":
    key = jax.random.PRNGKey(0)
    kx, kw, kb = jax.random.split(key, 3)

    # Small shapes consistent with Linear(1, 1): batch=8, in_features=1
    x = jax.random.normal(kx, (8, 1), dtype=jnp.float32)
    weight = jax.random.uniform(kw, (1, 1), minval=-1.0, maxval=1.0, dtype=jnp.float32)
    bias = jax.random.uniform(kb, (1,), minval=-1.0, maxval=1.0, dtype=jnp.float32)

    y = logistic_regression(x, weight, bias)
    jax.block_until_ready(y)
    y_ref = jax.nn.sigmoid(x @ weight.T + bias)
    assert y.shape == (8, 1)
    assert jnp.allclose(y, y_ref, atol=1e-5), (y, y_ref)

    # Ragged larger batch: exercises the cdiv grid (partial last block) + tail path.
    x2 = jax.random.normal(kx, (3000, 1), dtype=jnp.float32)
    y2 = logistic_regression(x2, weight, bias)
    jax.block_until_ready(y2)
    y2_ref = jax.nn.sigmoid(x2 @ weight.T + bias)
    assert y2.shape == (3000, 1)
    assert jnp.allclose(y2, y2_ref, atol=1e-5), "ragged/tiled path mismatch"

    # Exact multiple of 128: zero-copy path (free reshape, no tail, no concat).
    x3 = jax.random.normal(kx, (4096, 1), dtype=jnp.float32)
    y3 = logistic_regression(x3, weight, bias)
    jax.block_until_ready(y3)
    y3_ref = jax.nn.sigmoid(x3 @ weight.T + bias)
    assert y3.shape == (4096, 1)
    assert jnp.allclose(y3, y3_ref, atol=1e-5), "zero-copy path mismatch"

    print("KERNEL_OK")
</pallas_src>

<mosaic_0001>
module attributes {stable_mosaic.version = 11 : i64} {
  func.func @logreg_kernel(%arg0: i32, %arg1: memref<1x1xf32, #tpu.memory_space<smem>>, %arg2: memref<1x1xf32, #tpu.memory_space<smem>>, %arg3: memref<8x128xf32, #tpu.memory_space<vmem>>, %arg4: memref<8x128xf32, #tpu.memory_space<vmem>>) attributes {dimension_semantics = [#tpu.dimension_semantics<parallel>], iteration_bounds = array<i64: 1>, scalar_prefetch = 0 : i64, scratch_operands = 0 : i64, tpu.core_type = #tpu.core_type<tc>, window_params = [{transform_indices = @transform_0, window_bounds = array<i64: 1, 1>}, {transform_indices = @transform_1, window_bounds = array<i64: 1, 1>}, {transform_indices = @transform_2, window_bounds = array<i64: 8, 128>}, {transform_indices = @transform_3, window_bounds = array<i64: 8, 128>}]} {
    %c0 = arith.constant 0 : index
    %c0_0 = arith.constant 0 : index
    %0 = memref.load %arg1[%c0, %c0_0] : memref<1x1xf32, #tpu.memory_space<smem>>
    %c0_1 = arith.constant 0 : index
    %c0_2 = arith.constant 0 : index
    %1 = memref.load %arg2[%c0_1, %c0_2] : memref<1x1xf32, #tpu.memory_space<smem>>
    %c0_3 = arith.constant 0 : index
    %c0_4 = arith.constant 0 : index
    %2 = vector.load %arg3[%c0_3, %c0_4] : memref<8x128xf32, #tpu.memory_space<vmem>>, vector<8x128xf32>
    %3 = vector.broadcast %0 : f32 to vector<8x128xf32>
    %4 = arith.mulf %2, %3 : vector<8x128xf32>
    %5 = vector.broadcast %1 : f32 to vector<8x128xf32>
    %6 = arith.addf %4, %5 : vector<8x128xf32>
    %7 = math.tanh %6 : vector<8x128xf32>
    %cst = arith.constant 5.000000e-01 : f32
    %8 = vector.broadcast %cst : f32 to vector<8x128xf32>
    %9 = arith.mulf %8, %7 : vector<8x128xf32>
    %cst_5 = arith.constant 5.000000e-01 : f32
    %10 = vector.broadcast %cst_5 : f32 to vector<8x128xf32>
    %11 = arith.addf %9, %10 : vector<8x128xf32>
    %c0_6 = arith.constant 0 : index
    %c0_7 = arith.constant 0 : index
    %12 = vector.load %arg4[%c0_6, %c0_7] : memref<8x128xf32, #tpu.memory_space<vmem>>, vector<8x128xf32>
    tpu.vector_store %arg4[%c0_6, %c0_7], %11 {strides = array<i32>} : memref<8x128xf32, #tpu.memory_space<vmem>>, vector<8x128xf32>,
    return
  }
  func.func @transform_0(%arg0: i32) -> (i32, i32) {
    %c0_i32 = arith.constant 0 : i32
    %c0_i32_0 = arith.constant 0 : i32
    %c0_i32_1 = arith.constant 0 : i32
    return %c0_i32, %c0_i32_0 : i32, i32
  }
  func.func @transform_1(%arg0: i32) -> (i32, i32) {
    %c0_i32 = arith.constant 0 : i32
    %c0_i32_0 = arith.constant 0 : i32
    %c0_i32_1 = arith.constant 0 : i32
    return %c0_i32, %c0_i32_0 : i32, i32
  }
  func.func @transform_2(%arg0: i32) -> (i32, i32) {
    %c0_i32 = arith.constant 0 : i32
    %c0_i32_0 = arith.constant 0 : i32
    return %arg0, %c0_i32 : i32, i32
  }
  func.func @transform_3(%arg0: i32) -> (i32, i32) {
    %c0_i32 = arith.constant 0 : i32
    %c0_i32_0 = arith.constant 0 : i32
    return %arg0, %c0_i32 : i32, i32
  }
}

</mosaic_0001>

<bundles_post_ra>
// kernel: logistic_regression.1
= control target key start
LH: loop header
LB: loop body
LE: loop exit
PB: predicated region body
PF: predicated region fallthrough
CT: control target
= control target key end

     0   :  { %s65_s0 = inlined_call_operand.<no memory space> [shape: f32[1,1], index: 0, kind: input, shape index: {}]   ;;  %s66_s1 = inlined_call_operand.<no memory space> [shape: f32[1,1], index: 1, kind: input, shape index: {}]   ;;  %s67_s2 = inlined_call_operand.vmem [shape: f32[8,128], index: 2, kind: input, shape index: {}]   ;;  %s68_s3 = inlined_call_operand.vmem [shape: f32[8,128], index: 3, kind: output, shape index: {}]  }
   0x1   :  { %v18_v0 = vld [vmem:[%s67_s2] sm:$0xff]  ;;  %v19_v1 = vstv %s65_s0  ;;  %v21_v2 = vstv %s66_s1 }
   0x2   :  { %v20_v3 = vmul.f32 %v19_v1, %v18_v0 }
   0x4   :  { %v22_v4 = vadd.f32 %v21_v2, %v20_v3 }
   0x6   :  { %31 = vtanh.f32 %v22_v4 }
  0x13   :  { %v32_v5 = vpop.eup %31 }
  0x14   :  { %v24_v6 = vmul.f32 0.5, %v32_v5 }
  0x16   :  { %v25_v7 = vadd.f32 0.5, %v24_v6 }
  0x18   :  { %26 = vst [vmem:[%s68_s3] sm:$0xff] %v25_v7 }

</bundles_post_ra>
